<compile_context>
chip_gen: v7x
topology: tpu7x:2x2x1
jax: 0.10.0
libtpu: 0.0.40
codegen_flags: <defaults>
</compile_context>

<pallas_src>
import jax
import jax.numpy as jnp
from jax.experimental import pallas as pl
from jax.experimental.pallas import tpu as pltpu

# ----- static model config (Model(conv_depth, output_size=32, 16, 16)) -----
IMG_H = 16
IMG_W = 16
POOL = 8                  # maxpool_1_kernel_size
C_IN = 1                  # img_depth
C_OUT = 10
KSZ = 5
PAD = KSZ // 2
OUT_SIZE = 32             # RNN hidden size
PH = IMG_H // POOL        # 2
PW = IMG_W // POOL        # 2
NWIN = PH * PW            # 4 pooling windows
WIN = POOL * POOL         # 64 positions per window
KK = KSZ * KSZ            # 25 conv taps
KKB = KK + 1              # 26 = taps + ones row (conv bias)
KDIM = NWIN * KKB         # 104 reduction length of the conv matmul
KPAD = 128                # lane-padded reduction length
FLAT = C_OUT * NWIN       # 40 RNN input features
FPAD = 128                # lane-padded feature length


def _rnn_conv_kernel(patches_ref, at_ref, wih_ref, whh_ref, b_ref, h0_ref,
                     out_ref, h_scr):
    # patches_ref: (1, 64, 128)  per-step window-blocked im2col (pos, w*26+tap), zero lane-pad
    # at_ref:      (128, 128)    block-diagonal conv weights^T (+ bias row), zero pad
    # wih_ref:     (128, 32)     W_ih^T, rows 40.. zero
    # whh_ref:     (32, 32)      W_hh^T
    # b_ref:       (1, 32)       b_ih + b_hh
    # h0_ref:      (1, 32)       initial hidden state
    # out_ref:     (1, 1, 32)    this step's RNN output (== new hidden)
    # h_scr:       (1, 32)       hidden state carried across grid steps
    t = pl.program_id(0)

    @pl.when(t == 0)
    def _():
        h_scr[...] = h0_ref[...]

    # conv(+bias) for every (channel, pool-window) pair in one MXU matmul.
    conv_t = jnp.dot(patches_ref[0], at_ref[...],
                     preferred_element_type=jnp.float32)               # (64, 128)

    # maxpool(8x8) = max over the 64 in-window sublanes, then relu.
    # (zero-padded lanes/features stay 0 and are multiplied by zero W_ih^T rows.)
    x_row = jnp.maximum(jnp.max(conv_t, axis=0, keepdims=True), 0.0)   # (1, 128)

    # fused RNN cell, row-vector form (lane-dense (1,32) output).
    pre = (jnp.dot(x_row, wih_ref[...], preferred_element_type=jnp.float32)
           + jnp.dot(h_scr[...], whh_ref[...], preferred_element_type=jnp.float32)
           + b_ref[...])                                               # (1, 32)
    h = jnp.tanh(pre)
    h_scr[...] = h
    out_ref[0] = h


def prepare_params(params):
    """One-time parameter repacking (off the hot path)."""
    cw = params["conv_w"].reshape(C_OUT, KK).astype(jnp.float32)        # (10, 25)
    cb = params["conv_b"].astype(jnp.float32)                           # (10,)
    wb = jnp.concatenate([cw, cb[:, None]], axis=1)                     # (10, 26)
    eye_w = jnp.eye(NWIN, dtype=jnp.float32)                            # (4, 4)
    # A[c*4+w, w'*26+t] = wb[c, t] * (w == w')
    conv_a = (wb[:, None, None, :] * eye_w[None, :, :, None]).reshape(
        FLAT, KDIM)                                                     # (40, 104)
    conv_at = jnp.pad(conv_a.T, ((0, KPAD - KDIM), (0, FPAD - FLAT)))   # (128, 128)

    wih_t = jnp.pad(params["w_ih"].astype(jnp.float32).T,
                    ((0, FPAD - FLAT), (0, 0)))                         # (128, 32)
    whh_t = params["w_hh"].astype(jnp.float32).T                        # (32, 32)
    bias = (params["b_ih"] + params["b_hh"]).astype(jnp.float32).reshape(1, OUT_SIZE)
    return {"conv_at": conv_at, "wih_t": wih_t, "whh_t": whh_t, "bias": bias}


@jax.jit
def model_forward_seq(xs, h0, prepped):
    """xs: (T, 1, 16, 16) sequence of NCHW frames; h0: (1, 1, 32).

    Returns (outputs (T, 1, 1, 32), final hidden (1, 1, 32)) — equivalent to
    calling the PyTorch Model.forward T times with the carried self.h0.
    """
    T = xs.shape[0]
    img = xs.reshape(T, IMG_H, IMG_W).astype(jnp.float32)
    xp = jnp.pad(img, ((0, 0), (PAD, PAD), (PAD, PAD)))                 # (T, 20, 20)

    # Window-blocked im2col for the WHOLE sequence (one fusion per call):
    #   patches[t, pos, w*26 + tap], pos = position inside the 8x8 pool window,
    #   tap 25 of each window block is the ones row for the conv bias.
    planes = jnp.stack([xp[:, ki:ki + IMG_H, kj:kj + IMG_W]
                        for ki in range(KSZ) for kj in range(KSZ)], axis=1)  # (T,25,16,16)
    p = planes.reshape(T, KK, PH, POOL, PW, POOL)
    p = p.transpose(0, 3, 5, 2, 4, 1)                                   # (T, r, s, ph, pw, tap)
    p = p.reshape(T, WIN, NWIN, KK)
    p = jnp.concatenate([p, jnp.ones((T, WIN, NWIN, 1), jnp.float32)], axis=3)
    patches = jnp.pad(p.reshape(T, WIN, KDIM),
                      ((0, 0), (0, 0), (0, KPAD - KDIM)))               # (T, 64, 128)

    h0_row = h0.reshape(1, OUT_SIZE).astype(jnp.float32)

    def full(shape):
        return pl.BlockSpec(shape, lambda t, _s=len(shape): (0,) * _s)

    out = pl.pallas_call(
        _rnn_conv_kernel,
        out_shape=jax.ShapeDtypeStruct((T, 1, OUT_SIZE), jnp.float32),
        grid=(T,),
        in_specs=[
            pl.BlockSpec((1, WIN, KPAD), lambda t: (t, 0, 0)),   # per-step patches
            full((KPAD, FPAD)),                                  # conv weights^T
            full((FPAD, OUT_SIZE)),                              # W_ih^T
            full((OUT_SIZE, OUT_SIZE)),                          # W_hh^T
            full((1, OUT_SIZE)),                                 # bias
            full((1, OUT_SIZE)),                                 # h0
        ],
        out_specs=pl.BlockSpec((1, 1, OUT_SIZE), lambda t: (t, 0, 0)),
        scratch_shapes=[pltpu.VMEM((1, OUT_SIZE), jnp.float32)],
        compiler_params=pltpu.CompilerParams(
            dimension_semantics=("arbitrary",)),                 # sequential recurrence
    )(patches, prepped["conv_at"], prepped["wih_t"], prepped["whh_t"],
      prepped["bias"], h0_row)

    ys = out.reshape(T, 1, 1, OUT_SIZE)
    return ys, ys[-1]


def reference_forward(x, h0, params):
    """Pure-JAX single-step reference mirroring the PyTorch forward (high precision)."""
    hp = jax.lax.Precision.HIGHEST
    conv = jax.lax.conv_general_dilated(
        x.astype(jnp.float32), params["conv_w"], (1, 1), ((PAD, PAD), (PAD, PAD)),
        dimension_numbers=("NCHW", "OIHW", "NCHW"), precision=hp)
    conv = conv + params["conv_b"].reshape(1, C_OUT, 1, 1)
    pooled = jax.lax.reduce_window(conv, -jnp.inf, jax.lax.max,
                                   (1, 1, POOL, POOL), (1, 1, POOL, POOL), "VALID")
    act = jnp.maximum(pooled, 0.0)
    r = act.reshape(1, FLAT)
    pre = (jnp.dot(r, params["w_ih"].T, precision=hp) + params["b_ih"]
           + jnp.dot(h0.reshape(1, OUT_SIZE), params["w_hh"].T, precision=hp)
           + params["b_hh"])
    return jnp.tanh(pre).reshape(1, 1, OUT_SIZE)


if __name__ == "__main__":
    key = jax.random.PRNGKey(0)
    ks = jax.random.split(key, 8)
    cbound = 1.0 / float(C_IN * KSZ * KSZ) ** 0.5
    rbound = 1.0 / float(OUT_SIZE) ** 0.5
    params = {
        "conv_w": jax.random.uniform(ks[0], (C_OUT, C_IN, KSZ, KSZ), jnp.float32, -cbound, cbound),
        "conv_b": jax.random.uniform(ks[1], (C_OUT,), jnp.float32, -cbound, cbound),
        "w_ih":   jax.random.uniform(ks[2], (OUT_SIZE, FLAT), jnp.float32, -rbound, rbound),
        "w_hh":   jax.random.uniform(ks[3], (OUT_SIZE, OUT_SIZE), jnp.float32, -rbound, rbound),
        "b_ih":   jax.random.uniform(ks[4], (OUT_SIZE,), jnp.float32, -rbound, rbound),
        "b_hh":   jax.random.uniform(ks[5], (OUT_SIZE,), jnp.float32, -rbound, rbound),
    }
    prepped = prepare_params(params)

    T = 8
    xs = jax.random.normal(ks[6], (T, C_IN, IMG_H, IMG_W), jnp.float32)
    h0 = jnp.zeros((1, 1, OUT_SIZE), jnp.float32)   # Model.h0 initial state

    ys, hT = model_forward_seq(xs, h0, prepped)
    ys = jax.block_until_ready(ys)

    # Reference: call the single-step forward T times, threading the hidden state.
    h_ref = h0
    refs = []
    for t in range(T):
        h_ref = reference_forward(xs[t:t + 1], h_ref, params)
        refs.append(h_ref)
    refs = jnp.stack(refs, axis=0)                   # (T, 1, 1, 32)

    assert ys.shape == (T, 1, 1, OUT_SIZE)
    err = jnp.max(jnp.abs(ys - refs))
    assert jnp.allclose(ys, refs, atol=1e-4, rtol=1e-4), err
    assert jnp.allclose(hT, refs[-1], atol=1e-4, rtol=1e-4)
    print("KERNEL_OK")
</pallas_src>

<mosaic_0001>
module attributes {stable_mosaic.version = 11 : i64} {
  func.func @_rnn_conv_kernel(%arg0: i32, %arg1: memref<1x64x128xf32, #tpu.memory_space<vmem>>, %arg2: memref<128x128xf32, #tpu.memory_space<vmem>>, %arg3: memref<128x32xf32, #tpu.memory_space<vmem>>, %arg4: memref<32x32xf32, #tpu.memory_space<vmem>>, %arg5: memref<1x32xf32, #tpu.memory_space<vmem>>, %arg6: memref<1x32xf32, #tpu.memory_space<vmem>>, %arg7: memref<1x1x32xf32, #tpu.memory_space<vmem>>, %arg8: memref<1x32xf32, #tpu.memory_space<vmem>>) attributes {dimension_semantics = [#tpu.dimension_semantics<arbitrary>], iteration_bounds = array<i64: 8>, scalar_prefetch = 0 : i64, scratch_operands = 1 : i64, tpu.core_type = #tpu.core_type<tc>, window_params = [{transform_indices = @transform_0, window_bounds = array<i64: 1, 64, 128>}, {pipeline_mode = #tpu.pipeline_mode<synchronous>, transform_indices = @transform_1, window_bounds = array<i64: 128, 128>}, {pipeline_mode = #tpu.pipeline_mode<synchronous>, transform_indices = @transform_2, window_bounds = array<i64: 128, 32>}, {pipeline_mode = #tpu.pipeline_mode<synchronous>, transform_indices = @transform_3, window_bounds = array<i64: 32, 32>}, {pipeline_mode = #tpu.pipeline_mode<synchronous>, transform_indices = @transform_4, window_bounds = array<i64: 1, 32>}, {pipeline_mode = #tpu.pipeline_mode<synchronous>, transform_indices = @transform_5, window_bounds = array<i64: 1, 32>}, {transform_indices = @transform_6, window_bounds = array<i64: 1, 1, 32>}]} {
    %c0_i32 = arith.constant 0 : i32
    %0 = arith.cmpi eq, %arg0, %c0_i32 : i32
    %1 = arith.extui %0 : i1 to i32
    %c0_i32_0 = arith.constant 0 : i32
    %2 = arith.cmpi ne, %1, %c0_i32_0 : i32
    scf.if %2 {
      %c0_22 = arith.constant 0 : index
      %c0_23 = arith.constant 0 : index
      %24 = vector.load %arg6[%c0_22, %c0_23] : memref<1x32xf32, #tpu.memory_space<vmem>>, vector<1x32xf32>
      %c0_24 = arith.constant 0 : index
      %c0_25 = arith.constant 0 : index
      %25 = vector.load %arg8[%c0_24, %c0_25] : memref<1x32xf32, #tpu.memory_space<vmem>>, vector<1x32xf32>
      tpu.vector_store %arg8[%c0_24, %c0_25], %24 {strides = array<i32>} : memref<1x32xf32, #tpu.memory_space<vmem>>, vector<1x32xf32>,
    } else {
    }
    %c0 = arith.constant 0 : index
    %c0_1 = arith.constant 0 : index
    %c0_2 = arith.constant 0 : index
    %3 = vector.load %arg1[%c0, %c0_1, %c0_2] : memref<1x64x128xf32, #tpu.memory_space<vmem>>, vector<1x64x128xf32>
    %4 = vector.shape_cast %3 : vector<1x64x128xf32> to vector<64x128xf32>
    %c0_3 = arith.constant 0 : index
    %c0_4 = arith.constant 0 : index
    %5 = vector.load %arg2[%c0_3, %c0_4] : memref<128x128xf32, #tpu.memory_space<vmem>>, vector<128x128xf32>
    %cst = arith.constant dense<0.000000e+00> : vector<64x128xf32>
    %6 = tpu.matmul %4, %5, %cst {dimension_numbers = #tpu.dot_dimension_numbers<[1], [0], [0], [1], [0, 0, 1, 1], [], []>} : vector<64x128xf32>, vector<128x128xf32>, vector<64x128xf32> -> vector<64x128xf32>
    %cst_5 = arith.constant dense<0xFF800000> : vector<128xf32>
    %7 = vector.multi_reduction <maximumf>, %6, %cst_5 [0] : vector<64x128xf32> to vector<128xf32>
    %8 = vector.shape_cast %7 : vector<128xf32> to vector<1x128xf32>
    %cst_6 = arith.constant 0.000000e+00 : f32
    %9 = vector.broadcast %cst_6 : f32 to vector<1x128xf32>
    %10 = arith.maximumf %8, %9 : vector<1x128xf32>
    %c0_7 = arith.constant 0 : index
    %c0_8 = arith.constant 0 : index
    %11 = vector.load %arg3[%c0_7, %c0_8] : memref<128x32xf32, #tpu.memory_space<vmem>>, vector<128x32xf32>
    %cst_9 = arith.constant dense<0.000000e+00> : vector<1x32xf32>
    %12 = tpu.matmul %10, %11, %cst_9 {dimension_numbers = #tpu.dot_dimension_numbers<[1], [0], [0], [1], [0, 0, 1, 1], [], []>} : vector<1x128xf32>, vector<128x32xf32>, vector<1x32xf32> -> vector<1x32xf32>
    %c0_10 = arith.constant 0 : index
    %c0_11 = arith.constant 0 : index
    %13 = vector.load %arg8[%c0_10, %c0_11] : memref<1x32xf32, #tpu.memory_space<vmem>>, vector<1x32xf32>
    %c0_12 = arith.constant 0 : index
    %c0_13 = arith.constant 0 : index
    %14 = vector.load %arg4[%c0_12, %c0_13] : memref<32x32xf32, #tpu.memory_space<vmem>>, vector<32x32xf32>
    %cst_14 = arith.constant dense<0.000000e+00> : vector<1x32xf32>
    %15 = tpu.matmul %13, %14, %cst_14 {dimension_numbers = #tpu.dot_dimension_numbers<[1], [0], [0], [1], [0, 0, 1, 1], [], []>} : vector<1x32xf32>, vector<32x32xf32>, vector<1x32xf32> -> vector<1x32xf32>
    %16 = arith.addf %12, %15 : vector<1x32xf32>
    %c0_15 = arith.constant 0 : index
    %c0_16 = arith.constant 0 : index
    %17 = vector.load %arg5[%c0_15, %c0_16] : memref<1x32xf32, #tpu.memory_space<vmem>>, vector<1x32xf32>
    %18 = arith.addf %16, %17 : vector<1x32xf32>
    %19 = math.tanh %18 : vector<1x32xf32>
    %c0_17 = arith.constant 0 : index
    %c0_18 = arith.constant 0 : index
    %20 = vector.load %arg8[%c0_17, %c0_18] : memref<1x32xf32, #tpu.memory_space<vmem>>, vector<1x32xf32>
    tpu.vector_store %arg8[%c0_17, %c0_18], %19 {strides = array<i32>} : memref<1x32xf32, #tpu.memory_space<vmem>>, vector<1x32xf32>,
    %c0_19 = arith.constant 0 : index
    %c0_20 = arith.constant 0 : index
    %c0_21 = arith.constant 0 : index
    %21 = vector.load %arg7[%c0_19, %c0_20, %c0_21] : memref<1x1x32xf32, #tpu.memory_space<vmem>>, vector<1x1x32xf32>
    %22 = vector.shape_cast %21 : vector<1x1x32xf32> to vector<1x32xf32>
    %23 = vector.shape_cast %19 : vector<1x32xf32> to vector<1x1x32xf32>
    tpu.vector_store %arg7[%c0_19, %c0_20, %c0_21], %23 {strides = array<i32>} : memref<1x1x32xf32, #tpu.memory_space<vmem>>, vector<1x1x32xf32>,
    return
  }
  func.func @transform_0(%arg0: i32) -> (i32, i32, i32) {
    %c0_i32 = arith.constant 0 : i32
    %c0_i32_0 = arith.constant 0 : i32
    %c0_i32_1 = arith.constant 0 : i32
    return %arg0, %c0_i32, %c0_i32_0 : i32, i32, i32
  }
  func.func @transform_1(%arg0: i32) -> (i32, i32) {
    %c0_i32 = arith.constant 0 : i32
    %c0_i32_0 = arith.constant 0 : i32
    %c0_i32_1 = arith.constant 0 : i32
    return %c0_i32, %c0_i32_0 : i32, i32
  }
  func.func @transform_2(%arg0: i32) -> (i32, i32) {
    %c0_i32 = arith.constant 0 : i32
    %c0_i32_0 = arith.constant 0 : i32
    %c0_i32_1 = arith.constant 0 : i32
    return %c0_i32, %c0_i32_0 : i32, i32
  }
  func.func @transform_3(%arg0: i32) -> (i32, i32) {
    %c0_i32 = arith.constant 0 : i32
    %c0_i32_0 = arith.constant 0 : i32
    %c0_i32_1 = arith.constant 0 : i32
    return %c0_i32, %c0_i32_0 : i32, i32
  }
  func.func @transform_4(%arg0: i32) -> (i32, i32) {
    %c0_i32 = arith.constant 0 : i32
    %c0_i32_0 = arith.constant 0 : i32
    %c0_i32_1 = arith.constant 0 : i32
    return %c0_i32, %c0_i32_0 : i32, i32
  }
  func.func @transform_5(%arg0: i32) -> (i32, i32) {
    %c0_i32 = arith.constant 0 : i32
    %c0_i32_0 = arith.constant 0 : i32
    %c0_i32_1 = arith.constant 0 : i32
    return %c0_i32, %c0_i32_0 : i32, i32
  }
  func.func @transform_6(%arg0: i32) -> (i32, i32, i32) {
    %c0_i32 = arith.constant 0 : i32
    %c0_i32_0 = arith.constant 0 : i32
    %c0_i32_1 = arith.constant 0 : i32
    return %arg0, %c0_i32, %c0_i32_0 : i32, i32, i32
  }
}

</mosaic_0001>

<bundles_post_ra>
// kernel: model_forward_seq.1
= control target key start
LH: loop header
LB: loop body
LE: loop exit
PB: predicated region body
PF: predicated region fallthrough
CT: control target
= control target key end

     0   :  { %s885_s21 = smov 0   ;;  %s1045_s0 = inlined_call_operand.vmem [shape: f32[8,64,128], index: 0, kind: input, shape index: {}]   ;;  %s1046_s1 = inlined_call_operand.vmem [shape: f32[128,128], index: 1, kind: input, shape index: {}]   ;;  %s1047_s2 = inlined_call_operand.vmem [shape: f32[128,32], index: 2, kind: input, shape index: {}]   ;;  %s1048_s3 = inlined_call_operand.vmem [shape: f32[32,32], index: 3, kind: input, shape index: {}]   ;;  %s1049_s4 = inlined_call_operand.vmem [shape: f32[1,32], index: 4, kind: input, shape index: {}]   ;;  %s1050_s5 = inlined_call_operand.vmem [shape: f32[1,32], index: 5, kind: input, shape index: {}]   ;;  %s1051_s6 = inlined_call_operand.vmem [shape: f32[8,1,32], index: 6, kind: output, shape index: {}]  }
   0x1 LB: > { %s616_s22 = sadd.s32 4294967295, %s845_s21   ;;  %p620_p0 = scmp.ge.s32.totalorder %s845_s21, 1  ;;  %s845_s21 = sphi %s885_s21, %s16_s21  }
   0x2   : > { %p212_p1 = scmp.lt.s32.totalorder %s845_s21, 9 }
   0x4   : > { %p213_p2 = pnand %p620_p0, %p212_p1 }
   0x5   : > { %p240_p3 = scmp.lt.s32.totalorder (!%p213_p2), %s616_s22, 7  ;;  %p623_p4 = scmp.ne.s32.totalorder (!%p213_p2), %s616_s22, 0 }
   0x6   : > { %216 = sbr.rel (%p213_p2) target bundleno = 529 (0x211), region = 44 }
   0xd   : > { %s893_s23 = scalar_select %p240_p3, %s616_s22, 7 }
   0xe   : > { %251 = sbr.rel (%p623_p4) target bundleno = 21 (0x15), region = 48  ;;  %v252_v0 = vld [vmem:[%s1050_s5] sm:$0x1] (!%p623_p4)  ;;  %vm253_vm0 = vcmask (!%p623_p4), 253952  }
   0xf   : > { %s627_s24 = sshll.u32 %s893_s23, 6  ;;  %s247_s27 = scalar_lea.vmem %s1051_s6, %s893_s23  ;;  %254 = vst.msk [vmem:[#allocation2] sm:$0x1] (!%p623_p4), %vm253_vm0, %v252_v0 }
  0x10   : > { %s903_s30 = scalar_lea.vmem %s1045_s0, %s627_s24 }
  0x15 PF: > { %v263_v1 = vld [vmem:[%s1046_s1] sm:$0xff]  ;;  %v264_v2 = vld [vmem:[%s1046_s1 + $0x8] sm:$0xff]  ;;  %v265_v3 = vld [vmem:[%s1046_s1 + $0x10] sm:$0xff]  ;;  %v847_v6 = vmov 0.0|0.0   ;;  %vm848_vm1 = vmmov 0   ;;  %v849_v42 = vmov 0.0  }
  0x16   : > { %v764_v4 = vpack.c.bf16 %v264_v2, %v263_v1  ;;  %v266_v5 = vld [vmem:[%s1046_s1 + $0x18] sm:$0xff]  ;;  %796 = vmatprep.subr.bf16.mxu1 %v847_v6  ;;  %v267_v8 = vld [vmem:[%s1046_s1 + $0x20] sm:$0xff]  ;;  %v268_v9 = vld [vmem:[%s1046_s1 + $0x28] sm:$0xff]  ;;  %726 = vmatprep.mubr.msk.f32.mxu1 %vm848_vm1, %v849_v42  ;;  %vm419_vm2 = vcmask 261120   ;;  %vm566_vm3 = vcmask 253952  }
  0x17   : > { %v768_v7 = vpack.c.bf16 %v266_v5, %v265_v3  ;;  %v772_v10 = vpack.c.bf16 %v268_v9, %v267_v8  ;;  %v255_v11 = vld [vmem:[%s903_s30] sm:$0xff]  ;;  %v269_v12 = vld [vmem:[%s1046_s1 + $0x30] sm:$0xff]  ;;  %v270_v13 = vld [vmem:[%s1046_s1 + $0x38] sm:$0xff] }
  0x18   : > { %765 = vmatprep.subr.bf16.mxu0 %v764_v4  ;;  %706 = vmatprep.mubr.f32.mxu0 %v255_v11  ;;  %v415_v14 = vld [vmem:[%s1048_s3] sm:$0xff]  ;;  %v416_v15 = vld [vmem:[%s1048_s3 + $0x8] sm:$0xff]  ;;  %v417_v16 = vld [vmem:[%s1048_s3 + $0x10] sm:$0xff]  ;;  %v776_v17 = vpack.c.bf16 %v270_v13, %v269_v12 }
  0x19   : > { %767 = vmatpush3.bf16.msra.mxu0 %v764_v4  ;;  %v797_v18 = vpack.c.bf16 %v416_v15, %v415_v14  ;;  %v418_v19 = vld [vmem:[%s1048_s3 + $0x18] sm:$0xff]  ;;  %v271_v20 = vld [vmem:[%s1046_s1 + $0x40] sm:$0xff]  ;;  %v272_v21 = vld [vmem:[%s1046_s1 + $0x48] sm:$0xff] }
  0x1a   : > { %769 = vmatprep.subr.bf16.mxu0 %v768_v7  ;;  %v800_v22 = vpack.c.bf16 %v418_v19, %v417_v16  ;;  %v780_v23 = vpack.c.bf16 %v272_v21, %v271_v20  ;;  %v273_v24 = vld [vmem:[%s1046_s1 + $0x50] sm:$0xff]  ;;  %v274_v25 = vld [vmem:[%s1046_s1 + $0x58] sm:$0xff]  ;;  %v275_v27 = vld [vmem:[%s1046_s1 + $0x60] sm:$0xff] }
  0x1b   : > { %798 = vmatpush3.bf16.msra.mxu1 %v797_v18  ;;  %v784_v26 = vpack.c.bf16 %v274_v25, %v273_v24  ;;  %v276_v28 = vld [vmem:[%s1046_s1 + $0x68] sm:$0xff]  ;;  %v277_v30 = vld [vmem:[%s1046_s1 + $0x70] sm:$0xff]  ;;  %v278_v31 = vld [vmem:[%s1046_s1 + $0x78] sm:$0xff] }
  0x1c   : > { %799 = vmatprep.subr.bf16.mxu1 %v847_v6  ;;  %v788_v29 = vpack.c.bf16 %v276_v28, %v275_v27  ;;  %v792_v32 = vpack.c.bf16 %v278_v31, %v277_v30  ;;  %v256_v33 = vld [vmem:[%s903_s30 + $0x8] sm:$0xff]  ;;  %v257_v34 = vld [vmem:[%s903_s30 + $0x10] sm:$0xff]  ;;  %v258_v35 = vld [vmem:[%s903_s30 + $0x18] sm:$0xff] }
  0x1d   : > { %771 = vmatpush3.bf16.msra.mxu0 %v768_v7  ;;  %v259_v36 = vld [vmem:[%s903_s30 + $0x20] sm:$0xff]  ;;  %v260_v37 = vld [vmem:[%s903_s30 + $0x28] sm:$0xff]  ;;  %v261_v38 = vld [vmem:[%s903_s30 + $0x30] sm:$0xff] }
  0x1e   : > { %773 = vmatprep.subr.bf16.mxu0 %v772_v10  ;;  %v262_v39 = vld [vmem:[%s903_s30 + $0x38] sm:$0xff]  ;;  %v398_v40 = vld [vmem:[%s1047_s2] sm:$0xff]  ;;  %v399_v41 = vld [vmem:[%s1047_s2 + $0x8] sm:$0xff] }
  0x1f   : > { %801 = vmatpush3.bf16.msra.mxu1 %v800_v22  ;;  %v414_v43 = vld [vmem:[#allocation2] sm:$0x1]  ;;  %v803_v44 = vpack.c.bf16 %v399_v41, %v398_v40  ;;  %v400_v45 = vld [vmem:[%s1047_s2 + $0x10] sm:$0xff]  ;;  %v401_v46 = vld [vmem:[%s1047_s2 + $0x18] sm:$0xff] }
  0x20   : > { %802 = vmatprep.subr.bf16.mxu1 %v847_v6  ;;  %v806_v47 = vpack.c.bf16 %v401_v46, %v400_v45  ;;  %v402_v48 = vld [vmem:[%s1047_s2 + $0x20] sm:$0xff]  ;;  %v403_v49 = vld [vmem:[%s1047_s2 + $0x28] sm:$0xff]  ;;  %v404_v51 = vld [vmem:[%s1047_s2 + $0x30] sm:$0xff] }
  0x21   : > { %775 = vmatpush3.bf16.msra.mxu0 %v772_v10  ;;  %v809_v50 = vpack.c.bf16 %v403_v49, %v402_v48  ;;  %v405_v52 = vld [vmem:[%s1047_s2 + $0x38] sm:$0xff]  ;;  %v406_v54 = vld [vmem:[%s1047_s2 + $0x40] sm:$0xff]  ;;  %v407_v55 = vld [vmem:[%s1047_s2 + $0x48] sm:$0xff] }
  0x22   : > { %777 = vmatprep.subr.bf16.mxu0 %v776_v17  ;;  %727 = vmatmul.mubr.msk.f32.vlgmr.msra.gmra.mrb[0].mxu1 %vm419_vm2, %v414_v43  ;;  %v812_v53 = vpack.c.bf16 %v405_v52, %v404_v51  ;;  %v815_v56 = vpack.c.bf16 %v407_v55, %v406_v54  ;;  %v408_v57 = vld [vmem:[%s1047_s2 + $0x50] sm:$0xff]  ;;  %v409_v58 = vld [vmem:[%s1047_s2 + $0x58] sm:$0xff]  ;;  %v410_v60 = vld [vmem:[%s1047_s2 + $0x60] sm:$0xff] }
  0x23   : > { %804 = vmatpush3.bf16.msra.mxu1 %v803_v44  ;;  %761 = vmatprep.mubr.msk.f32.mxu1 %vm848_vm1, %v849_v42  ;;  %v818_v59 = vpack.c.bf16 %v409_v58, %v408_v57  ;;  %v411_v61 = vld [vmem:[%s1047_s2 + $0x68] sm:$0xff]  ;;  %v412_v63 = vld [vmem:[%s1047_s2 + $0x70] sm:$0xff]  ;;  %v413_v0 = vld [vmem:[%s1047_s2 + $0x78] sm:$0xff] }
  0x24   : > { %805 = vmatprep.subr.bf16.mxu1 %v847_v6  ;;  %v821_v62 = vpack.c.bf16 %v411_v61, %v410_v60  ;;  %v824_v1 = vpack.c.bf16 %v413_v0, %v412_v63  ;;  %v563_v27 = vld [vmem:[%s1049_s4] sm:$0x1] }
  0x25   : > { %779 = vmatpush3.bf16.msra.mxu0 %v776_v17 }
  0x26   : > { %781 = vmatprep.subr.bf16.mxu0 %v780_v23 }
  0x27   : > { %807 = vmatpush3.bf16.msra.mxu1 %v806_v47 }
  0x28   : > { %808 = vmatprep.subr.bf16.mxu1 %v847_v6 }
  0x29   : > { %783 = vmatpush3.bf16.msra.mxu0 %v780_v23 }
  0x2a   : > { %785 = vmatprep.subr.bf16.mxu0 %v784_v26 }
  0x2b   : > { %810 = vmatpush3.bf16.msra.mxu1 %v809_v50 }
  0x2c   : > { %811 = vmatprep.subr.bf16.mxu1 %v847_v6 }
  0x2d   : > { %787 = vmatpush3.bf16.msra.mxu0 %v784_v26 }
  0x2e   : > { %789 = vmatprep.subr.bf16.mxu0 %v788_v29 }
  0x2f   : > { %813 = vmatpush3.bf16.msra.mxu1 %v812_v53 }
  0x30   : > { %814 = vmatprep.subr.bf16.mxu1 %v847_v6 }
  0x31   : > { %791 = vmatpush3.bf16.msra.mxu0 %v788_v29 }
  0x32   : > { %793 = vmatprep.subr.bf16.mxu0 %v792_v32 }
  0x33   : > { %816 = vmatpush3.bf16.msra.mxu1 %v815_v56 }
  0x34   : > { %817 = vmatprep.subr.bf16.mxu1 %v847_v6 }
  0x35   : > { %795 = vmatpush3.bf16.msra.mxu0 %v792_v32 }
  0x37   : > { %819 = vmatpush3.bf16.msra.mxu1 %v818_v59 }
  0x38   : > { %707 = vmatmul.mubr.f32.vlgmr.msra.gmra.mrb[0].mxu0 %v256_v33  ;;  %820 = vmatprep.subr.bf16.mxu1 %v847_v6 }
  0x39   : > { %709 = vmatprep.mubr.f32.mxu0 %v257_v34 }
  0x3b   : > { %822 = vmatpush3.bf16.msra.mxu1 %v821_v62 }
  0x3c   : > { %710 = vmatmul.mubr.f32.gmra.mrb[2].mxu0 %v258_v35  ;;  %823 = vmatprep.subr.bf16.mxu1 %v847_v6 }
  0x3d   : > { %712 = vmatprep.mubr.f32.mxu0 %v259_v36 }
  0x3f   : > { %825 = vmatpush3.bf16.msra.mxu1 %v824_v1 }
  0x40   : > { %713 = vmatmul.mubr.f32.gmra.mrb[4].mxu0 %v260_v37 }
  0x41   : > { %715 = vmatprep.mubr.f32.mxu0 %v261_v38 }
  0x44   : > { %716 = vmatmul.mubr.f32.gmra.mrb[6].mxu0 %v262_v39 }
  0xf5   : > { %v489_v24 = vpop.f32.mrb[0].mxu1 }
  0xf6   : > { %v728_v25 = vpop.f32.mrb[1].mxu1 }
 0x10b   : > { %v708_v2 = vpop.f32.mrb[0].mxu0 }
 0x10c   : > { %v345_v3 = vpop.f32.mrb[1].mxu0 }
 0x10f   : > { %v711_v4 = vpop.f32.mrb[2].mxu0 }
 0x110   : > { %v355_v5 = vpop.f32.mrb[3].mxu0 }
 0x113   : > { %v714_v7 = vpop.f32.mrb[4].mxu0 }
 0x114   : > { %v385_v8 = vmax.f32 %v708_v2, %v714_v7  ;;  %v365_v9 = vpop.f32.mrb[5].mxu0 }
 0x115   : > { %v384_v10 = vmax.f32 %v345_v3, %v365_v9 }
 0x117   : > { %v388_v11 = vmax.f32 %v384_v10, %v385_v8  ;;  %v717_v12 = vpop.f32.mrb[6].mxu0 }
 0x118   : > { %v387_v13 = vmax.f32 %v711_v4, %v717_v12  ;;  %v375_v14 = vpop.f32.mrb[7].mxu0 }
 0x119   : > { %v386_v15 = vmax.f32 %v355_v5, %v375_v14 }
 0x11b   : > { %v389_v16 = vmax.f32 %v386_v15, %v387_v13 }
 0x11d   : > { %v390_v17 = vmax.f32 %v388_v11, %v389_v16 }
 0x11f   : > { %v391_v18 = vrot.slane %v390_v17, 4 }
 0x121   : > { %v392_v19 = vmax.f32 %v390_v17, %v391_v18 }
 0x123   : > { %v393_v20 = vrot.slane %v392_v19, 2 }
 0x125   : > { %v394_v6 = vmax.f32 %v392_v19, %v393_v20 }
 0x127   : > { %v395_v21 = vrot.slane %v394_v6, 1 }
 0x129   : > { %v396_v22 = vmax.f32 %v394_v6, %v395_v21 }
 0x12b   : > { %v397_v23 = vmax.f32 %v396_v22, 0.0 }
 0x12d   : > { %762 = vmatmul.mubr.f32.vlgmr.msra.gmra.mrb[2].mxu1 %v397_v23 }
 0x200   : > { %v559_v26 = vpop.f32.mrb[2].mxu1 }
 0x201   : > { %v560_v28 = vadd.f32 %v559_v26, %v489_v24  ;;  %v763_v29 = vpop.f32.mrb[3].mxu1 }
 0x203   : > { %v564_v30 = vadd.f32 %v563_v27, %v560_v28 }
 0x205   : > { %837 = vtanh.f32 %v564_v30 }
 0x20f   : > { %v838_v31 = vpop.eup %837 }
 0x210   : > { %567 = vst.msk [vmem:[#allocation2] sm:$0x1] %vm566_vm3, %v838_v31  ;;  %568 = vst.msk [vmem:[%s247_s27] sm:$0x1] %vm566_vm3, %v838_v31 }
 0x211 PF: > { %s16_s21 = sadd.s32 1, %s845_s21  }
 0x212   : > { %p13_p5 = scmp.ge.s32.totalorder %s16_s21, 10  }
 0x214   :  { %15 = sbr.rel (!%p13_p5) target bundleno = 1 (0x1), region = 78 }

</bundles_post_ra>
